<compile_context>
chip_gen: v6e
topology: v6e:2x2x1
jax: 0.10.0
libtpu: 0.0.40
codegen_flags: <defaults>
</compile_context>

<pallas_src>
import functools

import jax
import jax.numpy as jnp
from jax.experimental import pallas as pl
from jax.experimental.pallas import tpu as pltpu


def _round_up(x, m):
    return (x + m - 1) // m * m


def _chip_generation():
    """Best-effort TPU generation detection ('v5e' | 'v6e' | 'v7x' | 'unknown')."""
    try:
        kind = jax.devices()[0].device_kind.lower()
    except Exception:
        return "unknown"
    if "v5 lite" in kind or "v5e" in kind or "v5litepod" in kind:
        return "v5e"
    if "v6" in kind:
        return "v6e"
    if "v7" in kind:
        return "v7x"
    return "unknown"


def _mlp_fused_kernel(x_ref, *refs, n_layers, negative_slope, hidden_dtype):
    """All layers execute back-to-back in VMEM; one kernel launch total.

    x_ref : (TM, in_pad0)          f32   activation tile (zero-padded lanes)
    refs  : (w0, b0, ..., wL-1, bL-1, o_ref)
      w_l : (in_pad_l, out_pad_l)  bf16  VMEM-resident, padded region is zero
      b_l : (1, out_pad_l)         f32   padded region is zero
    o_ref : (TM, out_pad_last)     f32   lane-dense output tile
    """
    o_ref = refs[-1]
    h = x_ref[...]
    # TODO(synk): for very deep stacks (L >= 16) with uniform widths, switch to
    # a stacked-weight layout + lax.fori_loop to bound code size / vreg pressure.
    for l in range(n_layers):                           # unrolled at trace time
        w = refs[2 * l][...]                            # (in_pad_l, out_pad_l) bf16
        b = refs[2 * l + 1][...]                        # (1, out_pad_l) f32
        y = jnp.dot(h.astype(jnp.bfloat16), w,
                    preferred_element_type=jnp.float32) + b
        if l < n_layers - 1:
            y = jnp.where(y > 0, y, negative_slope * y)
            h = y.astype(hidden_dtype)                  # bf16 on v6e/v7x, f32 on v5e
        else:
            h = y
    o_ref[...] = h.astype(o_ref.dtype)


def mlp_forward(x, padded_params, *, in_dim, out_dim, negative_slope=0.01):
    """Fused MLP forward. x: (batch, in_dim) f32 -> (batch, out_dim) f32.

    padded_params: list of (w_pad bf16 (in_pad_l, out_pad_l), b_pad f32 (1, out_pad_l)).
    Padded rows/cols of each weight/bias must be zero.
    """
    batch = x.shape[0]
    n_layers = len(padded_params)
    in_pad0 = padded_params[0][0].shape[0]
    out_pad_last = padded_params[-1][0].shape[1]
    max_pad = max(w.shape[1] for w, _ in padded_params)

    chip = _chip_generation()
    hidden_dtype = jnp.bfloat16 if chip in ("v6e", "v7x") else jnp.float32

    # Batch tile: multiple of 16 (bf16 sublane packing); cap by MXU width per gen.
    tm_cap = 256 if chip in ("v6e", "v7x") else 128
    tm = min(_round_up(batch, 16), tm_cap)
    b_pad = _round_up(batch, tm)
    grid_m = b_pad // tm

    # Avoid materializing a padded copy when x is already aligned.
    if batch == b_pad and x.shape[1] == in_pad0:
        x_p = x.astype(jnp.float32)
    else:
        # TODO(synk): for batch >> tm, handle the ragged tail with a smaller last
        # tile / masked store instead of padding the whole batch in HBM.
        x_p = jnp.zeros((b_pad, in_pad0), jnp.float32).at[:batch, :in_dim].set(x)

    # --- VMEM budget (bytes), computed from actual buffers ------------------
    weight_bytes = sum(int(w.size) * w.dtype.itemsize for w, _ in padded_params)
    bias_bytes = sum(int(b.size) * b.dtype.itemsize for _, b in padded_params)
    act_io_bytes = 2 * tm * in_pad0 * 4 + 2 * tm * out_pad_last * 4   # double-buffered I/O tiles
    inter_bytes = 2 * tm * max_pad * 4                                # live inter-layer activations
    # Weights counted x2 as a safety margin in case single-buffering is rejected.
    needed = 2 * (weight_bytes + bias_bytes) + act_io_bytes + inter_bytes + (2 << 20)
    chip_vmem_cap = {"v5e": 100 << 20, "v6e": 100 << 20, "v7x": 48 << 20}.get(chip, 48 << 20)
    vmem_limit = int(max(16 << 20, min(needed, chip_vmem_cap)))
    # TODO(synk): if weight_bytes exceeds ~half the per-core VMEM cap (matters on
    # v7x's 64 MiB/TC), stream weights per layer with pltpu.emit_pipeline instead
    # of keeping the whole stack resident.

    kernel = functools.partial(
        _mlp_fused_kernel,
        n_layers=n_layers,
        negative_slope=negative_slope,
        hidden_dtype=hidden_dtype,
    )
    flat_params = [p for pair in padded_params for p in pair]

    def _build_and_call(single_buffer_weights):
        resident_kw = {"pipeline_mode": pl.Buffered(1)} if single_buffer_weights else {}
        in_specs = [pl.BlockSpec((tm, in_pad0), lambda i: (i, 0))]          # activations
        for w_p, b_p in padded_params:
            in_specs.append(pl.BlockSpec(w_p.shape, lambda i: (0, 0), **resident_kw))
            in_specs.append(pl.BlockSpec(b_p.shape, lambda i: (0, 0), **resident_kw))
        out = pl.pallas_call(
            kernel,
            out_shape=jax.ShapeDtypeStruct((b_pad, out_pad_last), jnp.float32),
            grid=(grid_m,),
            in_specs=in_specs,
            out_specs=pl.BlockSpec((tm, out_pad_last), lambda i: (i, 0)),
            compiler_params=pltpu.CompilerParams(
                dimension_semantics=("parallel",),
                vmem_limit_bytes=vmem_limit,
            ),
        )(x_p, *flat_params)
        return jax.block_until_ready(out)

    try:
        out = _build_and_call(True)
    except Exception:
        # Some Pallas versions reject Buffered(1); fall back to default pipelining.
        out = _build_and_call(False)

    return out[:batch, :out_dim]


class MLP:
    """JAX/Pallas equivalent of the PyTorch MLP module (forward pass)."""

    def __init__(self, input_size, hidden_layers, output_size, key,
                 negative_slope=0.01):
        dims = [input_size] + list(hidden_layers) + [output_size]
        self.negative_slope = negative_slope
        self.in_dim = input_size
        self.out_dim = output_size

        # Per-layer f32 params with PyTorch nn.Linear-style uniform init,
        # plus per-layer zero-padded kernel operands (bf16 weights, f32 biases).
        self.params = []
        self.padded_params = []
        for i in range(len(dims) - 1):
            fan_in, fan_out = dims[i], dims[i + 1]
            key, kw, kb = jax.random.split(key, 3)
            bound = 1.0 / (fan_in ** 0.5)
            w = jax.random.uniform(kw, (fan_in, fan_out), jnp.float32, -bound, bound)
            b = jax.random.uniform(kb, (fan_out,), jnp.float32, -bound, bound)
            self.params.append((w, b))

            in_pad = _round_up(fan_in, 128)
            out_pad = _round_up(fan_out, 128)
            # Padded rows/cols are zero -> padded activation lanes stay exactly zero.
            w_p = (jnp.zeros((in_pad, out_pad), jnp.float32)
                   .at[:fan_in, :fan_out].set(w)).astype(jnp.bfloat16)
            b_p = jnp.zeros((1, out_pad), jnp.float32).at[0, :fan_out].set(b)
            self.padded_params.append((w_p, b_p))

    def __call__(self, x):
        return mlp_forward(x, self.padded_params,
                           in_dim=self.in_dim, out_dim=self.out_dim,
                           negative_slope=self.negative_slope)


def mlp_reference_bf16(params, x, negative_slope=0.01):
    """Pure-JAX reference with the same bf16-input / f32-accumulate numerics."""
    n = len(params)
    h = x
    for i, (w, b) in enumerate(params):
        y = jnp.dot(h.astype(jnp.bfloat16), w.astype(jnp.bfloat16),
                    preferred_element_type=jnp.float32) + b[None, :]
        if i != n - 1:
            y = jnp.where(y > 0, y, negative_slope * y)
        h = y
    return h


def mlp_reference_f32(params, x, negative_slope=0.01):
    """Full-f32 reference (semantic sanity check; bf16 MXU path drifts slightly)."""
    n = len(params)
    h = x
    for i, (w, b) in enumerate(params):
        y = h @ w + b[None, :]
        if i != n - 1:
            y = jnp.where(y > 0, y, negative_slope * y)
        h = y
    return h


if __name__ == "__main__":
    key = jax.random.PRNGKey(0)
    key, xkey, pkey = jax.random.split(key, 3)

    batch = 8
    input_size = 32
    hidden_layers = [64, 48]
    output_size = 16

    x = jax.random.normal(xkey, (batch, input_size), dtype=jnp.float32)
    model = MLP(input_size, hidden_layers, output_size, pkey)

    out = jax.block_until_ready(model(x))
    assert out.shape == (batch, output_size)

    ref_bf16 = mlp_reference_bf16(model.params, x)
    ref_f32 = mlp_reference_f32(model.params, x)
    assert jnp.allclose(out, ref_bf16, atol=1e-4, rtol=1e-4), "mismatch vs bf16 reference"
    assert jnp.allclose(out, ref_f32, atol=1e-1, rtol=1e-1), "mismatch vs f32 reference"

    print("KERNEL_OK")
</pallas_src>

<mosaic_0001>
module attributes {stable_mosaic.version = 11 : i64} {
  func.func @_mlp_fused_kernel(%arg0: i32, %arg1: memref<16x128xf32, #tpu.memory_space<vmem>>, %arg2: memref<128x128xbf16, #tpu.memory_space<vmem>>, %arg3: memref<1x128xf32, #tpu.memory_space<vmem>>, %arg4: memref<128x128xbf16, #tpu.memory_space<vmem>>, %arg5: memref<1x128xf32, #tpu.memory_space<vmem>>, %arg6: memref<128x128xbf16, #tpu.memory_space<vmem>>, %arg7: memref<1x128xf32, #tpu.memory_space<vmem>>, %arg8: memref<16x128xf32, #tpu.memory_space<vmem>>) attributes {dimension_semantics = [#tpu.dimension_semantics<parallel>], iteration_bounds = array<i64: 1>, scalar_prefetch = 0 : i64, scratch_operands = 0 : i64, tpu.core_type = #tpu.core_type<tc>, window_params = [{transform_indices = @transform_0, window_bounds = array<i64: 16, 128>}, {pipeline_mode = #tpu.pipeline_mode<synchronous>, transform_indices = @transform_1, window_bounds = array<i64: 128, 128>}, {pipeline_mode = #tpu.pipeline_mode<synchronous>, transform_indices = @transform_2, window_bounds = array<i64: 1, 128>}, {pipeline_mode = #tpu.pipeline_mode<synchronous>, transform_indices = @transform_3, window_bounds = array<i64: 128, 128>}, {pipeline_mode = #tpu.pipeline_mode<synchronous>, transform_indices = @transform_4, window_bounds = array<i64: 1, 128>}, {pipeline_mode = #tpu.pipeline_mode<synchronous>, transform_indices = @transform_5, window_bounds = array<i64: 128, 128>}, {pipeline_mode = #tpu.pipeline_mode<synchronous>, transform_indices = @transform_6, window_bounds = array<i64: 1, 128>}, {transform_indices = @transform_7, window_bounds = array<i64: 16, 128>}]} {
    %c0 = arith.constant 0 : index
    %c0_0 = arith.constant 0 : index
    %0 = vector.load %arg1[%c0, %c0_0] : memref<16x128xf32, #tpu.memory_space<vmem>>, vector<16x128xf32>
    %c0_1 = arith.constant 0 : index
    %c0_2 = arith.constant 0 : index
    %1 = vector.load %arg2[%c0_1, %c0_2] : memref<128x128xbf16, #tpu.memory_space<vmem>>, vector<128x128xbf16>
    %c0_3 = arith.constant 0 : index
    %c0_4 = arith.constant 0 : index
    %2 = vector.load %arg3[%c0_3, %c0_4] : memref<1x128xf32, #tpu.memory_space<vmem>>, vector<1x128xf32>
    %3 = arith.truncf %0 : vector<16x128xf32> to vector<16x128xbf16>
    %cst = arith.constant dense<0.000000e+00> : vector<16x128xf32>
    %4 = tpu.matmul %3, %1, %cst {dimension_numbers = #tpu.dot_dimension_numbers<[1], [0], [0], [1], [0, 0, 1, 1], [], []>} : vector<16x128xbf16>, vector<128x128xbf16>, vector<16x128xf32> -> vector<16x128xf32>
    %5 = vector.broadcast %2 : vector<1x128xf32> to vector<16x128xf32>
    %6 = arith.addf %4, %5 : vector<16x128xf32>
    %cst_5 = arith.constant 0.000000e+00 : f32
    %7 = vector.broadcast %cst_5 : f32 to vector<16x128xf32>
    %8 = arith.cmpf ogt, %6, %7 : vector<16x128xf32>
    %cst_6 = arith.constant 0.00999999977 : f32
    %9 = vector.broadcast %cst_6 : f32 to vector<16x128xf32>
    %10 = arith.mulf %9, %6 : vector<16x128xf32>
    %11 = arith.select %8, %6, %10 : vector<16x128xi1>, vector<16x128xf32>
    %c0_7 = arith.constant 0 : index
    %c0_8 = arith.constant 0 : index
    %12 = vector.load %arg4[%c0_7, %c0_8] : memref<128x128xbf16, #tpu.memory_space<vmem>>, vector<128x128xbf16>
    %c0_9 = arith.constant 0 : index
    %c0_10 = arith.constant 0 : index
    %13 = vector.load %arg5[%c0_9, %c0_10] : memref<1x128xf32, #tpu.memory_space<vmem>>, vector<1x128xf32>
    %14 = arith.truncf %11 : vector<16x128xf32> to vector<16x128xbf16>
    %cst_11 = arith.constant dense<0.000000e+00> : vector<16x128xf32>
    %15 = tpu.matmul %14, %12, %cst_11 {dimension_numbers = #tpu.dot_dimension_numbers<[1], [0], [0], [1], [0, 0, 1, 1], [], []>} : vector<16x128xbf16>, vector<128x128xbf16>, vector<16x128xf32> -> vector<16x128xf32>
    %16 = vector.broadcast %13 : vector<1x128xf32> to vector<16x128xf32>
    %17 = arith.addf %15, %16 : vector<16x128xf32>
    %cst_12 = arith.constant 0.000000e+00 : f32
    %18 = vector.broadcast %cst_12 : f32 to vector<16x128xf32>
    %19 = arith.cmpf ogt, %17, %18 : vector<16x128xf32>
    %cst_13 = arith.constant 0.00999999977 : f32
    %20 = vector.broadcast %cst_13 : f32 to vector<16x128xf32>
    %21 = arith.mulf %20, %17 : vector<16x128xf32>
    %22 = arith.select %19, %17, %21 : vector<16x128xi1>, vector<16x128xf32>
    %c0_14 = arith.constant 0 : index
    %c0_15 = arith.constant 0 : index
    %23 = vector.load %arg6[%c0_14, %c0_15] : memref<128x128xbf16, #tpu.memory_space<vmem>>, vector<128x128xbf16>
    %c0_16 = arith.constant 0 : index
    %c0_17 = arith.constant 0 : index
    %24 = vector.load %arg7[%c0_16, %c0_17] : memref<1x128xf32, #tpu.memory_space<vmem>>, vector<1x128xf32>
    %25 = arith.truncf %22 : vector<16x128xf32> to vector<16x128xbf16>
    %cst_18 = arith.constant dense<0.000000e+00> : vector<16x128xf32>
    %26 = tpu.matmul %25, %23, %cst_18 {dimension_numbers = #tpu.dot_dimension_numbers<[1], [0], [0], [1], [0, 0, 1, 1], [], []>} : vector<16x128xbf16>, vector<128x128xbf16>, vector<16x128xf32> -> vector<16x128xf32>
    %27 = vector.broadcast %24 : vector<1x128xf32> to vector<16x128xf32>
    %28 = arith.addf %26, %27 : vector<16x128xf32>
    %c0_19 = arith.constant 0 : index
    %c0_20 = arith.constant 0 : index
    %29 = vector.load %arg8[%c0_19, %c0_20] : memref<16x128xf32, #tpu.memory_space<vmem>>, vector<16x128xf32>
    tpu.vector_store %arg8[%c0_19, %c0_20], %28 {strides = array<i32>} : memref<16x128xf32, #tpu.memory_space<vmem>>, vector<16x128xf32>,
    return
  }
  func.func @transform_0(%arg0: i32) -> (i32, i32) {
    %c0_i32 = arith.constant 0 : i32
    %c0_i32_0 = arith.constant 0 : i32
    return %arg0, %c0_i32 : i32, i32
  }
  func.func @transform_1(%arg0: i32) -> (i32, i32) {
    %c0_i32 = arith.constant 0 : i32
    %c0_i32_0 = arith.constant 0 : i32
    %c0_i32_1 = arith.constant 0 : i32
    return %c0_i32, %c0_i32_0 : i32, i32
  }
  func.func @transform_2(%arg0: i32) -> (i32, i32) {
    %c0_i32 = arith.constant 0 : i32
    %c0_i32_0 = arith.constant 0 : i32
    %c0_i32_1 = arith.constant 0 : i32
    return %c0_i32, %c0_i32_0 : i32, i32
  }
  func.func @transform_3(%arg0: i32) -> (i32, i32) {
    %c0_i32 = arith.constant 0 : i32
    %c0_i32_0 = arith.constant 0 : i32
    %c0_i32_1 = arith.constant 0 : i32
    return %c0_i32, %c0_i32_0 : i32, i32
  }
  func.func @transform_4(%arg0: i32) -> (i32, i32) {
    %c0_i32 = arith.constant 0 : i32
    %c0_i32_0 = arith.constant 0 : i32
    %c0_i32_1 = arith.constant 0 : i32
    return %c0_i32, %c0_i32_0 : i32, i32
  }
  func.func @transform_5(%arg0: i32) -> (i32, i32) {
    %c0_i32 = arith.constant 0 : i32
    %c0_i32_0 = arith.constant 0 : i32
    %c0_i32_1 = arith.constant 0 : i32
    return %c0_i32, %c0_i32_0 : i32, i32
  }
  func.func @transform_6(%arg0: i32) -> (i32, i32) {
    %c0_i32 = arith.constant 0 : i32
    %c0_i32_0 = arith.constant 0 : i32
    %c0_i32_1 = arith.constant 0 : i32
    return %c0_i32, %c0_i32_0 : i32, i32
  }
  func.func @transform_7(%arg0: i32) -> (i32, i32) {
    %c0_i32 = arith.constant 0 : i32
    %c0_i32_0 = arith.constant 0 : i32
    return %arg0, %c0_i32 : i32, i32
  }
}

module attributes {stable_mosaic.version = 11 : i64} {
  func.func @_mlp_fused_kernel(%arg0: i32, %arg1: memref<16x128xf32, #tpu.memory_space<vmem>>, %arg2: memref<128x128xbf16, #tpu.memory_space<vmem>>, %arg3: memref<1x128xf32, #tpu.memory_space<vmem>>, %arg4: memref<128x128xbf16, #tpu.memory_space<vmem>>, %arg5: memref<1x128xf32, #tpu.memory_space<vmem>>, %arg6: memref<128x128xbf16, #tpu.memory_space<vmem>>, %arg7: memref<1x128xf32, #tpu.memory_space<vmem>>, %arg8: memref<16x128xf32, #tpu.memory_space<vmem>>) attributes {dimension_semantics = [#tpu.dimension_semantics<parallel>], iteration_bounds = array<i64: 1>, scalar_prefetch = 0 : i64, scratch_operands = 0 : i64, tpu.core_type = #tpu.core_type<tc>, window_params = [{transform_indices = @transform_0, window_bounds = array<i64: 16, 128>}, {pipeline_mode = #tpu.pipeline_mode<synchronous>, transform_indices = @transform_1, window_bounds = array<i64: 128, 128>}, {pipeline_mode = #tpu.pipeline_mode<synchronous>, transform_indices = @transform_2, window_bounds = array<i64: 1, 128>}, {pipeline_mode = #tpu.pipeline_mode<synchronous>, transform_indices = @transform_3, window_bounds = array<i64: 128, 128>}, {pipeline_mode = #tpu.pipeline_mode<synchronous>, transform_indices = @transform_4, window_bounds = array<i64: 1, 128>}, {pipeline_mode = #tpu.pipeline_mode<synchronous>, transform_indices = @transform_5, window_bounds = array<i64: 128, 128>}, {pipeline_mode = #tpu.pipeline_mode<synchronous>, transform_indices = @transform_6, window_bounds = array<i64: 1, 128>}, {transform_indices = @transform_7, window_bounds = array<i64: 16, 128>}]} {
    %c0 = arith.constant 0 : index
    %c0_0 = arith.constant 0 : index
    %0 = vector.load %arg1[%c0, %c0_0] : memref<16x128xf32, #tpu.memory_space<vmem>>, vector<16x128xf32>
    %c0_1 = arith.constant 0 : index
    %c0_2 = arith.constant 0 : index
    %1 = vector.load %arg2[%c0_1, %c0_2] : memref<128x128xbf16, #tpu.memory_space<vmem>>, vector<128x128xbf16>
    %c0_3 = arith.constant 0 : index
    %c0_4 = arith.constant 0 : index
    %2 = vector.load %arg3[%c0_3, %c0_4] : memref<1x128xf32, #tpu.memory_space<vmem>>, vector<1x128xf32>
    %3 = arith.truncf %0 : vector<16x128xf32> to vector<16x128xbf16>
    %cst = arith.constant dense<0.000000e+00> : vector<16x128xf32>
    %4 = tpu.matmul %3, %1, %cst {dimension_numbers = #tpu.dot_dimension_numbers<[1], [0], [0], [1], [0, 0, 1, 1], [], []>} : vector<16x128xbf16>, vector<128x128xbf16>, vector<16x128xf32> -> vector<16x128xf32>
    %5 = vector.broadcast %2 : vector<1x128xf32> to vector<16x128xf32>
    %6 = arith.addf %4, %5 : vector<16x128xf32>
    %cst_5 = arith.constant 0.000000e+00 : f32
    %7 = vector.broadcast %cst_5 : f32 to vector<16x128xf32>
    %8 = arith.cmpf ogt, %6, %7 : vector<16x128xf32>
    %cst_6 = arith.constant 0.00999999977 : f32
    %9 = vector.broadcast %cst_6 : f32 to vector<16x128xf32>
    %10 = arith.mulf %9, %6 : vector<16x128xf32>
    %11 = arith.select %8, %6, %10 : vector<16x128xi1>, vector<16x128xf32>
    %c0_7 = arith.constant 0 : index
    %c0_8 = arith.constant 0 : index
    %12 = vector.load %arg4[%c0_7, %c0_8] : memref<128x128xbf16, #tpu.memory_space<vmem>>, vector<128x128xbf16>
    %c0_9 = arith.constant 0 : index
    %c0_10 = arith.constant 0 : index
    %13 = vector.load %arg5[%c0_9, %c0_10] : memref<1x128xf32, #tpu.memory_space<vmem>>, vector<1x128xf32>
    %14 = arith.truncf %11 : vector<16x128xf32> to vector<16x128xbf16>
    %cst_11 = arith.constant dense<0.000000e+00> : vector<16x128xf32>
    %15 = tpu.matmul %14, %12, %cst_11 {dimension_numbers = #tpu.dot_dimension_numbers<[1], [0], [0], [1], [0, 0, 1, 1], [], []>} : vector<16x128xbf16>, vector<128x128xbf16>, vector<16x128xf32> -> vector<16x128xf32>
    %16 = vector.broadcast %13 : vector<1x128xf32> to vector<16x128xf32>
    %17 = arith.addf %15, %16 : vector<16x128xf32>
    %cst_12 = arith.constant 0.000000e+00 : f32
    %18 = vector.broadcast %cst_12 : f32 to vector<16x128xf32>
    %19 = arith.cmpf ogt, %17, %18 : vector<16x128xf32>
    %cst_13 = arith.constant 0.00999999977 : f32
    %20 = vector.broadcast %cst_13 : f32 to vector<16x128xf32>
    %21 = arith.mulf %20, %17 : vector<16x128xf32>
    %22 = arith.select %19, %17, %21 : vector<16x128xi1>, vector<16x128xf32>
    %c0_14 = arith.constant 0 : index
    %c0_15 = arith.constant 0 : index
    %23 = vector.load %arg6[%c0_14, %c0_15] : memref<128x128xbf16, #tpu.memory_space<vmem>>, vector<128x128xbf16>
    %c0_16 = arith.constant 0 : index
    %c0_17 = arith.constant 0 : index
    %24 = vector.load %arg7[%c0_16, %c0_17] : memref<1x128xf32, #tpu.memory_space<vmem>>, vector<1x128xf32>
    %25 = arith.truncf %22 : vector<16x128xf32> to vector<16x128xbf16>
    %cst_18 = arith.constant dense<0.000000e+00> : vector<16x128xf32>
    %26 = tpu.matmul %25, %23, %cst_18 {dimension_numbers = #tpu.dot_dimension_numbers<[1], [0], [0], [1], [0, 0, 1, 1], [], []>} : vector<16x128xbf16>, vector<128x128xbf16>, vector<16x128xf32> -> vector<16x128xf32>
    %27 = vector.broadcast %24 : vector<1x128xf32> to vector<16x128xf32>
    %28 = arith.addf %26, %27 : vector<16x128xf32>
    %c0_19 = arith.constant 0 : index
    %c0_20 = arith.constant 0 : index
    %29 = vector.load %arg8[%c0_19, %c0_20] : memref<16x128xf32, #tpu.memory_space<vmem>>, vector<16x128xf32>
    tpu.vector_store %arg8[%c0_19, %c0_20], %28 {strides = array<i32>} : memref<16x128xf32, #tpu.memory_space<vmem>>, vector<16x128xf32>,
    return
  }
  func.func @transform_0(%arg0: i32) -> (i32, i32) {
    %c0_i32 = arith.constant 0 : i32
    %c0_i32_0 = arith.constant 0 : i32
    return %arg0, %c0_i32 : i32, i32
  }
  func.func @transform_1(%arg0: i32) -> (i32, i32) {
    %c0_i32 = arith.constant 0 : i32
    %c0_i32_0 = arith.constant 0 : i32
    %c0_i32_1 = arith.constant 0 : i32
    return %c0_i32, %c0_i32_0 : i32, i32
  }
  func.func @transform_2(%arg0: i32) -> (i32, i32) {
    %c0_i32 = arith.constant 0 : i32
    %c0_i32_0 = arith.constant 0 : i32
    %c0_i32_1 = arith.constant 0 : i32
    return %c0_i32, %c0_i32_0 : i32, i32
  }
  func.func @transform_3(%arg0: i32) -> (i32, i32) {
    %c0_i32 = arith.constant 0 : i32
    %c0_i32_0 = arith.constant 0 : i32
    %c0_i32_1 = arith.constant 0 : i32
    return %c0_i32, %c0_i32_0 : i32, i32
  }
  func.func @transform_4(%arg0: i32) -> (i32, i32) {
    %c0_i32 = arith.constant 0 : i32
    %c0_i32_0 = arith.constant 0 : i32
    %c0_i32_1 = arith.constant 0 : i32
    return %c0_i32, %c0_i32_0 : i32, i32
  }
  func.func @transform_5(%arg0: i32) -> (i32, i32) {
    %c0_i32 = arith.constant 0 : i32
    %c0_i32_0 = arith.constant 0 : i32
    %c0_i32_1 = arith.constant 0 : i32
    return %c0_i32, %c0_i32_0 : i32, i32
  }
  func.func @transform_6(%arg0: i32) -> (i32, i32) {
    %c0_i32 = arith.constant 0 : i32
    %c0_i32_0 = arith.constant 0 : i32
    %c0_i32_1 = arith.constant 0 : i32
    return %c0_i32, %c0_i32_0 : i32, i32
  }
  func.func @transform_7(%arg0: i32) -> (i32, i32) {
    %c0_i32 = arith.constant 0 : i32
    %c0_i32_0 = arith.constant 0 : i32
    return %arg0, %c0_i32 : i32, i32
  }
}

</mosaic_0001>

<bundles_post_ra>
// kernel: tpu_custom_call.1
= control target key start
LH: loop header
LB: loop body
LE: loop exit
PB: predicated region body
PF: predicated region fallthrough
CT: control target
= control target key end

     0   :  { %12 = vsyncpa [#allocation3], 0  ;;  %s834_s0 = inlined_call_operand.hbm [shape: f32[16,128], index: 0, kind: input, shape index: {}]   ;;  %s835_s1 = inlined_call_operand.hbm [shape: bf16[128,128], index: 1, kind: input, shape index: {}]   ;;  %s836_s2 = inlined_call_operand.vmem [shape: f32[1,128], index: 2, kind: input, shape index: {}]   ;;  %s837_s3 = inlined_call_operand.hbm [shape: bf16[128,128], index: 3, kind: input, shape index: {}]   ;;  %s838_s4 = inlined_call_operand.vmem [shape: f32[1,128], index: 4, kind: input, shape index: {}]   ;;  %s839_s5 = inlined_call_operand.hbm [shape: bf16[128,128], index: 5, kind: input, shape index: {}]   ;;  %s840_s6 = inlined_call_operand.vmem [shape: f32[1,128], index: 6, kind: input, shape index: {}]   ;;  %s841_s7 = inlined_call_operand.hbm [shape: f32[16,128], index: 7, kind: output, shape index: {}]  }
   0x1   :  { %13 = vsyncpa [#allocation6], 0 }
   0x2   :  { %14 = vsyncpa [#allocation9], 0 }
   0x3   :  { %15 = vsyncpa [#allocation4], 0  ;;  %s714_s24 = smov [#allocation5]  }
   0x4   :  { %s33_s25 = sshll.u32 %s714_s24, 4  ;;  %s34_s25 = int_to_ptr.vmem [resolvable:$true] %s33_s25 }
   0x5   :  { %s614_s26 = scalar_lea.vmem %s34_s25, 1024  ;;  %p619_p1 = scmp.lt.s32.totalorder %s34_s25, %s34_s25 }
   0x6   :  { %p615_p0 = scmp.ne.s32.totalorder %s34_s25, %s614_s26  ;;  %p620_p2 = scmp.lt.s32.totalorder %s614_s26, %s614_s26 }
   0x8   :  { %p621_p3 = por %p620_p2, %p619_p1 }
   0xa   :  { %p622_p4 = pnand %p621_p3, %p615_p0 }
   0xc   :  { %625 = shalt.err (!%p622_p4)
}
   0xd   :  { %s715_s27 = smov 64   ;;  %s716_s28 = smov 4  }
   0xe   :  { %39 = dma.hbm_to_vmem [thread:$0]  %s835_s1, 1024, %s34_s25, [#allocation6], %s715_s27, %s715_s27, %s716_s28  }
   0xf   :  { %s717_s8 = smov [#allocation2]  }
  0x10   :  { %s21_s9 = sshll.u32 %s717_s8, 4  ;;  %s22_s9 = int_to_ptr.vmem [resolvable:$true] %s21_s9 }
  0x11   :  { %s634_s10 = scalar_lea.vmem %s22_s9, 256  ;;  %p639_p6 = scmp.lt.s32.totalorder %s22_s9, %s22_s9 }
  0x12   :  { %p635_p5 = scmp.ne.s32.totalorder %s22_s9, %s634_s10  ;;  %p640_p7 = scmp.lt.s32.totalorder %s634_s10, %s634_s10 }
  0x14   :  { %p641_p8 = por %p640_p7, %p639_p6 }
  0x16   :  { %p642_p9 = pnand %p641_p8, %p635_p5 }
  0x18   :  { %645 = shalt.err (!%p642_p9)
}
  0x19   :  { %s718_s11 = smov 128   ;;  %s719_s12 = smov 8  }
  0x1a   :  { %27 = dma.hbm_to_vmem [thread:$0]  %s834_s0, 256, %s22_s9, [#allocation3], %s718_s11, %s718_s11, %s719_s12  }
  0x1b   :  { %s720_s1 = smov [#allocation7]   ;;  %s721_s16 = smov [#allocation8]  }
  0x1c   :  { %s47_s15 = sshll.u32 %s720_s1, 4  ;;  %s61_s17 = sshll.u32 %s721_s16, 4  ;;  %s48_s15 = int_to_ptr.vmem [resolvable:$true] %s47_s15  ;;  %s62_s17 = int_to_ptr.vmem [resolvable:$true] %s61_s17 }
  0x1d   :  { %s654_s18 = scalar_lea.vmem %s48_s15, 1024  ;;  %p659_p11 = scmp.lt.s32.totalorder %s48_s15, %s48_s15 }
  0x1e   :  { %p655_p10 = scmp.ne.s32.totalorder %s48_s15, %s654_s18  ;;  %p660_p12 = scmp.lt.s32.totalorder %s654_s18, %s654_s18 }
  0x20   :  { %p661_p13 = por %p660_p12, %p659_p11 }
  0x22   :  { %p662_p0 = pnand %p661_p13, %p655_p10 }
  0x24   :  { %665 = shalt.err (!%p662_p0)
}
  0x25   :  { %53 = dma.hbm_to_vmem [thread:$0]  %s837_s3, 1024, %s48_s15, [#allocation6], %s715_s27, %s715_s27, %s716_s28  }
  0x26   :  { %s674_s0 = scalar_lea.vmem %s62_s17, 1024  ;;  %p679_p2 = scmp.lt.s32.totalorder %s62_s17, %s62_s17 }
  0x27   :  { %p675_p1 = scmp.ne.s32.totalorder %s62_s17, %s674_s0  ;;  %p680_p3 = scmp.lt.s32.totalorder %s674_s0, %s674_s0 }
  0x29   :  { %p681_p4 = por %p680_p3, %p679_p2 }
  0x2b   :  { %p682_p5 = pnand %p681_p4, %p675_p1 }
  0x2d   :  { %685 = shalt.err (!%p682_p5)
}
  0x2e   :  { %67 = dma.hbm_to_vmem [thread:$0]  %s839_s5, 1024, %s62_s17, [#allocation9], %s715_s27, %s715_s27, %s716_s28  }
  0x2f   :  { %706 = dma.done.wait [#allocation3], 256  }
  0x30   :  { %707 = vsyncadd [#allocation3], 4294967040 }
  0x31   :  { %708 = dma.done.wait [#allocation6], 2048  }
  0x32   :  { %709 = vsyncadd [#allocation6], 4294965248 }
  0x33   :  { %710 = dma.done.wait [#allocation9], 1024  }
  0x34   :  { %711 = vsyncadd [#allocation9], 4294966272  ;;  %v722_v0 = vmov 0.0   ;;  %vm723_vm0 = vmmov 0   ;;  %v582_v1 = vld [vmem:[#allocation5 + $0x38] sm:$0xff]   ;;  %v583_v2 = vld [vmem:[#allocation5 + $0x30] sm:$0xff]  }
  0x35   :  { %511 = vmatprep.subr.bf16.mxu0 %v722_v0  ;;  %527 = vmatprep.mubr.msk.bf16.mxu0 %vm723_vm0, %v722_v0  ;;  %v584_v3 = vld [vmem:[#allocation5 + $0x28] sm:$0xff]   ;;  %v590_v4 = vld [vmem:[#allocation7 + $0x38] sm:$0xff]   ;;  %v585_v5 = vld [vmem:[#allocation5 + $0x20] sm:$0xff]  }
  0x36   :  { %531 = vmatprep.subr.bf16.mxu1 %v722_v0  ;;  %547 = vmatprep.mubr.msk.bf16.mxu1 %vm723_vm0, %v722_v0  ;;  %v591_v6 = vld [vmem:[#allocation7 + $0x30] sm:$0xff]   ;;  %v586_v7 = vld [vmem:[#allocation5 + $0x18] sm:$0xff]   ;;  %v592_v8 = vld [vmem:[#allocation7 + $0x28] sm:$0xff]  }
  0x37   :  { %512 = vmatpush3.bf16.msra.mxu0 %v582_v1  ;;  %532 = vmatpush3.bf16.msra.mxu1 %v590_v4  ;;  %v587_v9 = vld [vmem:[#allocation5 + $0x10] sm:$0xff]   ;;  %v593_v10 = vld [vmem:[#allocation7 + $0x20] sm:$0xff]   ;;  %v588_v11 = vld [vmem:[#allocation5 + $0x8] sm:$0xff]  }
  0x38   :  { %513 = vmatprep.subr.bf16.mxu0 %v722_v0  ;;  %533 = vmatprep.subr.bf16.mxu1 %v722_v0  ;;  %v594_v12 = vld [vmem:[#allocation7 + $0x18] sm:$0xff]   ;;  %v589_v13 = vld [vmem:[#allocation5] sm:$0xff]   ;;  %v83_v14 = vld [vmem:[#allocation2] sm:$0xff] }
  0x39   :  { %v84_v15 = vld [vmem:[#allocation2 + $0x8] sm:$0xff]  ;;  %v595_v17 = vld [vmem:[#allocation7 + $0x10] sm:$0xff]   ;;  %v596_v18 = vld [vmem:[#allocation7 + $0x8] sm:$0xff]  }
  0x3a   :  { %v102_v16 = vpack.c.bf16 %v84_v15, %v83_v14  ;;  %v597_v19 = vld [vmem:[#allocation7] sm:$0xff]   ;;  %v598_v20 = vld [vmem:[#allocation8 + $0x38] sm:$0xff]   ;;  %v599_v21 = vld [vmem:[#allocation8 + $0x30] sm:$0xff]  }
  0x3b   :  { %514 = vmatpush3.bf16.msra.mxu0 %v583_v2  ;;  %534 = vmatpush3.bf16.msra.mxu1 %v591_v6  ;;  %v600_v22 = vld [vmem:[#allocation8 + $0x28] sm:$0xff]   ;;  %v601_v23 = vld [vmem:[#allocation8 + $0x20] sm:$0xff]   ;;  %v602_v24 = vld [vmem:[#allocation8 + $0x18] sm:$0xff]  }
  0x3c   :  { %515 = vmatprep.subr.bf16.mxu0 %v722_v0  ;;  %535 = vmatprep.subr.bf16.mxu1 %v722_v0  ;;  %v457_v25 = vld [vmem:[%s836_s2] ss:$0 sm:$0xff]  ;;  %v604_v38 = vld [vmem:[#allocation8 + $0x8] sm:$0xff]   ;;  %v605_v39 = vld [vmem:[#allocation8] sm:$0xff]  }
  0x3d   :  { %v603_v37 = vld [vmem:[#allocation8 + $0x10] sm:$0xff]  }
  0x3e   :  { %v466_v40 = vld [vmem:[%s838_s4] ss:$0 sm:$0xff]  ;;  %s724_s4 = smov [#allocation10]  }
  0x3f   :  { %516 = vmatpush3.bf16.msra.mxu0 %v584_v3  ;;  %536 = vmatpush3.bf16.msra.mxu1 %v592_v8  ;;  %v475_v52 = vld [vmem:[%s840_s6] ss:$0 sm:$0xff]  ;;  %s443_s26 = sshll.u32 %s724_s4, 4  ;;  %s444_s26 = int_to_ptr.vmem [resolvable:$true] %s443_s26 }
  0x40   :  { %517 = vmatprep.subr.bf16.mxu0 %v722_v0  ;;  %537 = vmatprep.subr.bf16.mxu1 %v722_v0  ;;  %s686_s27 = scalar_lea.vmem %s444_s26, 256  ;;  %p691_p7 = scmp.lt.s32.totalorder %s444_s26, %s444_s26 }
  0x41   :  { %p687_p6 = scmp.ne.s32.totalorder %s444_s26, %s686_s27  ;;  %p692_p8 = scmp.lt.s32.totalorder %s686_s27, %s686_s27 }
  0x43   :  { %518 = vmatpush3.bf16.msra.mxu0 %v585_v5  ;;  %538 = vmatpush3.bf16.msra.mxu1 %v593_v10  ;;  %p693_p9 = por %p692_p8, %p691_p7 }
  0x44   :  { %519 = vmatprep.subr.bf16.mxu0 %v722_v0  ;;  %539 = vmatprep.subr.bf16.mxu1 %v722_v0 }
  0x45   :  { %p694_p10 = pnand %p693_p9, %p687_p6 }
  0x47   :  { %520 = vmatpush3.bf16.msra.mxu0 %v586_v7  ;;  %540 = vmatpush3.bf16.msra.mxu1 %v594_v12 }
  0x48   :  { %521 = vmatprep.subr.bf16.mxu0 %v722_v0  ;;  %541 = vmatprep.subr.bf16.mxu1 %v722_v0 }
  0x4b   :  { %522 = vmatpush3.bf16.msra.mxu0 %v587_v9  ;;  %542 = vmatpush3.bf16.msra.mxu1 %v595_v17 }
  0x4c   :  { %523 = vmatprep.subr.bf16.mxu0 %v722_v0  ;;  %543 = vmatprep.subr.bf16.mxu1 %v722_v0 }
  0x4f   :  { %524 = vmatpush3.bf16.msra.mxu0 %v588_v11  ;;  %544 = vmatpush3.bf16.msra.mxu1 %v596_v18 }
  0x50   :  { %525 = vmatprep.subr.bf16.mxu0 %v722_v0  ;;  %545 = vmatprep.subr.bf16.mxu1 %v722_v0 }
  0x53   :  { %526 = vmatpush3.bf16.msra.mxu0 %v589_v13  ;;  %546 = vmatpush3.bf16.msra.mxu1 %v597_v19 }
  0x54   :  { %551 = vmatprep.subr.bf16.mxu0 %v722_v0 }
  0x56   :  { %528 = vmatmul.mubr.bf16.vlgmr.msra.gmra.mxu0 %v102_v16 }
  0x57   :  { %567 = vmatprep.mubr.msk.bf16.mxu0 %vm723_vm0, %v722_v0  ;;  %552 = vmatpush3.bf16.msra.mxu0 %v598_v20 }
  0x58   :  { %553 = vmatprep.subr.bf16.mxu0 %v722_v0 }
  0x5b   :  { %554 = vmatpush3.bf16.msra.mxu0 %v599_v21 }
  0x5c   :  { %555 = vmatprep.subr.bf16.mxu0 %v722_v0 }
  0x5f   :  { %556 = vmatpush3.bf16.msra.mxu0 %v600_v22 }
  0x60   :  { %557 = vmatprep.subr.bf16.mxu0 %v722_v0 }
  0x63   :  { %558 = vmatpush3.bf16.msra.mxu0 %v601_v23 }
  0x64   :  { %559 = vmatprep.subr.bf16.mxu0 %v722_v0 }
  0x67   :  { %560 = vmatpush3.bf16.msra.mxu0 %v602_v24 }
  0x68   :  { %561 = vmatprep.subr.bf16.mxu0 %v722_v0 }
  0x6b   :  { %562 = vmatpush3.bf16.msra.mxu0 %v603_v37 }
  0x6c   :  { %563 = vmatprep.subr.bf16.mxu0 %v722_v0 }
  0x6f   :  { %564 = vmatpush3.bf16.msra.mxu0 %v604_v38 }
  0x70   :  { %565 = vmatprep.subr.bf16.mxu0 %v722_v0 }
  0x73   :  { %566 = vmatpush3.bf16.msra.mxu0 %v605_v39 }
 0x116   :  { %v191_v26 = vpop.f32.mrf.mxu0 }
 0x117   :  { %v192_v27 = vadd.f32 %v457_v25, %v191_v26 }
 0x118   :  { %v529_v28 = vpop.f32.mrf.mxu0 }
 0x119   :  { %v200_v30 = vmul.f32 0.01, %v192_v27  ;;  %vm198_vm1 = vcmp.gt.f32.partialorder %v192_v27, 0.0 }
 0x11a   :  { %v194_v29 = vpop.f32.mrf.mxu0 }
 0x11b   :  { %v195_v31 = vadd.f32 %v457_v25, %v194_v29  ;;  %v202_v34 = vsel %vm198_vm1, %v192_v27, %v200_v30 }
 0x11c   :  { %v530_v32 = vpop.f32.mrf.mxu0 }
 0x11d   :  { %vm199_vm2 = vcmp.gt.f32.partialorder %v195_v31, 0.0  ;;  %v201_v33 = vmul.f32 0.01, %v195_v31 }
 0x11f   :  { %v203_v35 = vsel %vm199_vm2, %v195_v31, %v201_v33 }
 0x120   :  { %v221_v36 = vpack.c.bf16 %v203_v35, %v202_v34 }
 0x122   :  { %548 = vmatmul.mubr.bf16.vlgmr.msra.gmra.mxu1 %v221_v36 }
 0x1e2   :  { %v310_v41 = vpop.f32.mrf.mxu1 }
 0x1e3   :  { %v311_v42 = vadd.f32 %v466_v40, %v310_v41 }
 0x1e4   :  { %v549_v43 = vpop.f32.mrf.mxu1 }
 0x1e5   :  { %v319_v45 = vmul.f32 0.01, %v311_v42  ;;  %vm317_vm3 = vcmp.gt.f32.partialorder %v311_v42, 0.0 }
 0x1e6   :  { %v313_v44 = vpop.f32.mrf.mxu1 }
 0x1e7   :  { %v314_v46 = vadd.f32 %v466_v40, %v313_v44  ;;  %v321_v49 = vsel %vm317_vm3, %v311_v42, %v319_v45 }
 0x1e8   :  { %v550_v47 = vpop.f32.mrf.mxu1 }
 0x1e9   :  { %vm318_vm4 = vcmp.gt.f32.partialorder %v314_v46, 0.0  ;;  %v320_v48 = vmul.f32 0.01, %v314_v46 }
 0x1eb   :  { %v322_v50 = vsel %vm318_vm4, %v314_v46, %v320_v48 }
 0x1ec   :  { %v340_v51 = vpack.c.bf16 %v322_v50, %v321_v49 }
 0x1ee   :  { %568 = vmatmul.mubr.bf16.vlgmr.msra.gmra.mxu0 %v340_v51 }
 0x2ae   :  { %v429_v53 = vpop.f32.mrf.mxu0 }
 0x2af   :  { %v430_v54 = vadd.f32 %v475_v52, %v429_v53 }
 0x2b0   :  { %v569_v55 = vpop.f32.mrf.mxu0 }
 0x2b1   :  { %436 = vst [vmem:[#allocation10] sm:$0xff] %v430_v54 }
 0x2b2   :  { %v432_v56 = vpop.f32.mrf.mxu0 }
 0x2b3   :  { %v433_v57 = vadd.f32 %v475_v52, %v432_v56 }
 0x2b4   :  { %v570_v58 = vpop.f32.mrf.mxu0 }
 0x2b5   :  { %437 = vst [vmem:[#allocation10 + $0x8] sm:$0xff] %v433_v57 }
 0x2b6   :  { %697 = shalt.err (!%p694_p10)
}
 0x2b7   :  { %449 = dma.vmem_to_hbm [thread:$0]  %s444_s26, 256, %s841_s7, [#allocation4], %s718_s11, %s718_s11, %s719_s12  }
 0x2b8   :  { %712 = dma.done.wait [#allocation4], 256  }
 0x2b9   :  { %713 = vsyncadd [#allocation4], 4294967040 }
 0x2ba   :  { %453 = vsyncpa [#allocation3], 1 }
 0x2bb   :  { %454 = vsyncpa [#allocation6], 1 }
 0x2bc   :  { %455 = vsyncpa [#allocation9], 1 }
 0x2bd   :  { %456 = vsyncpa [#allocation4], 1 }

// kernel: tpu_custom_call.1
= control target key start
LH: loop header
LB: loop body
LE: loop exit
PB: predicated region body
PF: predicated region fallthrough
CT: control target
= control target key end

     0   :  { %12 = vsyncpa [#allocation3], 0  ;;  %s834_s0 = inlined_call_operand.hbm [shape: f32[16,128], index: 0, kind: input, shape index: {}]   ;;  %s835_s1 = inlined_call_operand.hbm [shape: bf16[128,128], index: 1, kind: input, shape index: {}]   ;;  %s836_s2 = inlined_call_operand.vmem [shape: f32[1,128], index: 2, kind: input, shape index: {}]   ;;  %s837_s3 = inlined_call_operand.hbm [shape: bf16[128,128], index: 3, kind: input, shape index: {}]   ;;  %s838_s4 = inlined_call_operand.vmem [shape: f32[1,128], index: 4, kind: input, shape index: {}]   ;;  %s839_s5 = inlined_call_operand.hbm [shape: bf16[128,128], index: 5, kind: input, shape index: {}]   ;;  %s840_s6 = inlined_call_operand.vmem [shape: f32[1,128], index: 6, kind: input, shape index: {}]   ;;  %s841_s7 = inlined_call_operand.hbm [shape: f32[16,128], index: 7, kind: output, shape index: {}]  }
   0x1   :  { %13 = vsyncpa [#allocation6], 0 }
   0x2   :  { %14 = vsyncpa [#allocation9], 0 }
   0x3   :  { %15 = vsyncpa [#allocation4], 0  ;;  %s714_s24 = smov [#allocation5]  }
   0x4   :  { %s33_s25 = sshll.u32 %s714_s24, 4  ;;  %s34_s25 = int_to_ptr.vmem [resolvable:$true] %s33_s25 }
   0x5   :  { %s614_s26 = scalar_lea.vmem %s34_s25, 1024  ;;  %p619_p1 = scmp.lt.s32.totalorder %s34_s25, %s34_s25 }
   0x6   :  { %p615_p0 = scmp.ne.s32.totalorder %s34_s25, %s614_s26  ;;  %p620_p2 = scmp.lt.s32.totalorder %s614_s26, %s614_s26 }
   0x8   :  { %p621_p3 = por %p620_p2, %p619_p1 }
   0xa   :  { %p622_p4 = pnand %p621_p3, %p615_p0 }
   0xc   :  { %625 = shalt.err (!%p622_p4)
}
   0xd   :  { %s715_s27 = smov 64   ;;  %s716_s28 = smov 4  }
   0xe   :  { %39 = dma.hbm_to_vmem [thread:$0]  %s835_s1, 1024, %s34_s25, [#allocation6], %s715_s27, %s715_s27, %s716_s28  }
   0xf   :  { %s717_s8 = smov [#allocation2]  }
  0x10   :  { %s21_s9 = sshll.u32 %s717_s8, 4  ;;  %s22_s9 = int_to_ptr.vmem [resolvable:$true] %s21_s9 }
  0x11   :  { %s634_s10 = scalar_lea.vmem %s22_s9, 256  ;;  %p639_p6 = scmp.lt.s32.totalorder %s22_s9, %s22_s9 }
  0x12   :  { %p635_p5 = scmp.ne.s32.totalorder %s22_s9, %s634_s10  ;;  %p640_p7 = scmp.lt.s32.totalorder %s634_s10, %s634_s10 }
  0x14   :  { %p641_p8 = por %p640_p7, %p639_p6 }
  0x16   :  { %p642_p9 = pnand %p641_p8, %p635_p5 }
  0x18   :  { %645 = shalt.err (!%p642_p9)
}
  0x19   :  { %s718_s11 = smov 128   ;;  %s719_s12 = smov 8  }
  0x1a   :  { %27 = dma.hbm_to_vmem [thread:$0]  %s834_s0, 256, %s22_s9, [#allocation3], %s718_s11, %s718_s11, %s719_s12  }
  0x1b   :  { %s720_s1 = smov [#allocation7]   ;;  %s721_s16 = smov [#allocation8]  }
  0x1c   :  { %s47_s15 = sshll.u32 %s720_s1, 4  ;;  %s61_s17 = sshll.u32 %s721_s16, 4  ;;  %s48_s15 = int_to_ptr.vmem [resolvable:$true] %s47_s15  ;;  %s62_s17 = int_to_ptr.vmem [resolvable:$true] %s61_s17 }
  0x1d   :  { %s654_s18 = scalar_lea.vmem %s48_s15, 1024  ;;  %p659_p11 = scmp.lt.s32.totalorder %s48_s15, %s48_s15 }
  0x1e   :  { %p655_p10 = scmp.ne.s32.totalorder %s48_s15, %s654_s18  ;;  %p660_p12 = scmp.lt.s32.totalorder %s654_s18, %s654_s18 }
  0x20   :  { %p661_p13 = por %p660_p12, %p659_p11 }
  0x22   :  { %p662_p0 = pnand %p661_p13, %p655_p10 }
  0x24   :  { %665 = shalt.err (!%p662_p0)
}
  0x25   :  { %53 = dma.hbm_to_vmem [thread:$0]  %s837_s3, 1024, %s48_s15, [#allocation6], %s715_s27, %s715_s27, %s716_s28  }
  0x26   :  { %s674_s0 = scalar_lea.vmem %s62_s17, 1024  ;;  %p679_p2 = scmp.lt.s32.totalorder %s62_s17, %s62_s17 }
  0x27   :  { %p675_p1 = scmp.ne.s32.totalorder %s62_s17, %s674_s0  ;;  %p680_p3 = scmp.lt.s32.totalorder %s674_s0, %s674_s0 }
  0x29   :  { %p681_p4 = por %p680_p3, %p679_p2 }
  0x2b   :  { %p682_p5 = pnand %p681_p4, %p675_p1 }
  0x2d   :  { %685 = shalt.err (!%p682_p5)
}
  0x2e   :  { %67 = dma.hbm_to_vmem [thread:$0]  %s839_s5, 1024, %s62_s17, [#allocation9], %s715_s27, %s715_s27, %s716_s28  }
  0x2f   :  { %706 = dma.done.wait [#allocation3], 256  }
  0x30   :  { %707 = vsyncadd [#allocation3], 4294967040 }
  0x31   :  { %708 = dma.done.wait [#allocation6], 2048  }
  0x32   :  { %709 = vsyncadd [#allocation6], 4294965248 }
  0x33   :  { %710 = dma.done.wait [#allocation9], 1024  }
  0x34   :  { %711 = vsyncadd [#allocation9], 4294966272  ;;  %v722_v0 = vmov 0.0   ;;  %vm723_vm0 = vmmov 0   ;;  %v582_v1 = vld [vmem:[#allocation5 + $0x38] sm:$0xff]   ;;  %v583_v2 = vld [vmem:[#allocation5 + $0x30] sm:$0xff]  }
  0x35   :  { %511 = vmatprep.subr.bf16.mxu0 %v722_v0  ;;  %527 = vmatprep.mubr.msk.bf16.mxu0 %vm723_vm0, %v722_v0  ;;  %v584_v3 = vld [vmem:[#allocation5 + $0x28] sm:$0xff]   ;;  %v590_v4 = vld [vmem:[#allocation7 + $0x38] sm:$0xff]   ;;  %v585_v5 = vld [vmem:[#allocation5 + $0x20] sm:$0xff]  }
  0x36   :  { %531 = vmatprep.subr.bf16.mxu1 %v722_v0  ;;  %547 = vmatprep.mubr.msk.bf16.mxu1 %vm723_vm0, %v722_v0  ;;  %v591_v6 = vld [vmem:[#allocation7 + $0x30] sm:$0xff]   ;;  %v586_v7 = vld [vmem:[#allocation5 + $0x18] sm:$0xff]   ;;  %v592_v8 = vld [vmem:[#allocation7 + $0x28] sm:$0xff]  }
  0x37   :  { %512 = vmatpush3.bf16.msra.mxu0 %v582_v1  ;;  %532 = vmatpush3.bf16.msra.mxu1 %v590_v4  ;;  %v587_v9 = vld [vmem:[#allocation5 + $0x10] sm:$0xff]   ;;  %v593_v10 = vld [vmem:[#allocation7 + $0x20] sm:$0xff]   ;;  %v588_v11 = vld [vmem:[#allocation5 + $0x8] sm:$0xff]  }
  0x38   :  { %513 = vmatprep.subr.bf16.mxu0 %v722_v0  ;;  %533 = vmatprep.subr.bf16.mxu1 %v722_v0  ;;  %v594_v12 = vld [vmem:[#allocation7 + $0x18] sm:$0xff]   ;;  %v589_v13 = vld [vmem:[#allocation5] sm:$0xff]   ;;  %v83_v14 = vld [vmem:[#allocation2] sm:$0xff] }
  0x39   :  { %v84_v15 = vld [vmem:[#allocation2 + $0x8] sm:$0xff]  ;;  %v595_v17 = vld [vmem:[#allocation7 + $0x10] sm:$0xff]   ;;  %v596_v18 = vld [vmem:[#allocation7 + $0x8] sm:$0xff]  }
  0x3a   :  { %v102_v16 = vpack.c.bf16 %v84_v15, %v83_v14  ;;  %v597_v19 = vld [vmem:[#allocation7] sm:$0xff]   ;;  %v598_v20 = vld [vmem:[#allocation8 + $0x38] sm:$0xff]   ;;  %v599_v21 = vld [vmem:[#allocation8 + $0x30] sm:$0xff]  }
  0x3b   :  { %514 = vmatpush3.bf16.msra.mxu0 %v583_v2  ;;  %534 = vmatpush3.bf16.msra.mxu1 %v591_v6  ;;  %v600_v22 = vld [vmem:[#allocation8 + $0x28] sm:$0xff]   ;;  %v601_v23 = vld [vmem:[#allocation8 + $0x20] sm:$0xff]   ;;  %v602_v24 = vld [vmem:[#allocation8 + $0x18] sm:$0xff]  }
  0x3c   :  { %515 = vmatprep.subr.bf16.mxu0 %v722_v0  ;;  %535 = vmatprep.subr.bf16.mxu1 %v722_v0  ;;  %v457_v25 = vld [vmem:[%s836_s2] ss:$0 sm:$0xff]  ;;  %v604_v38 = vld [vmem:[#allocation8 + $0x8] sm:$0xff]   ;;  %v605_v39 = vld [vmem:[#allocation8] sm:$0xff]  }
  0x3d   :  { %v603_v37 = vld [vmem:[#allocation8 + $0x10] sm:$0xff]  }
  0x3e   :  { %v466_v40 = vld [vmem:[%s838_s4] ss:$0 sm:$0xff]  ;;  %s724_s4 = smov [#allocation10]  }
  0x3f   :  { %516 = vmatpush3.bf16.msra.mxu0 %v584_v3  ;;  %536 = vmatpush3.bf16.msra.mxu1 %v592_v8  ;;  %v475_v52 = vld [vmem:[%s840_s6] ss:$0 sm:$0xff]  ;;  %s443_s26 = sshll.u32 %s724_s4, 4  ;;  %s444_s26 = int_to_ptr.vmem [resolvable:$true] %s443_s26 }
  0x40   :  { %517 = vmatprep.subr.bf16.mxu0 %v722_v0  ;;  %537 = vmatprep.subr.bf16.mxu1 %v722_v0  ;;  %s686_s27 = scalar_lea.vmem %s444_s26, 256  ;;  %p691_p7 = scmp.lt.s32.totalorder %s444_s26, %s444_s26 }
  0x41   :  { %p687_p6 = scmp.ne.s32.totalorder %s444_s26, %s686_s27  ;;  %p692_p8 = scmp.lt.s32.totalorder %s686_s27, %s686_s27 }
  0x43   :  { %518 = vmatpush3.bf16.msra.mxu0 %v585_v5  ;;  %538 = vmatpush3.bf16.msra.mxu1 %v593_v10  ;;  %p693_p9 = por %p692_p8, %p691_p7 }
  0x44   :  { %519 = vmatprep.subr.bf16.mxu0 %v722_v0  ;;  %539 = vmatprep.subr.bf16.mxu1 %v722_v0 }
  0x45   :  { %p694_p10 = pnand %p693_p9, %p687_p6 }
  0x47   :  { %520 = vmatpush3.bf16.msra.mxu0 %v586_v7  ;;  %540 = vmatpush3.bf16.msra.mxu1 %v594_v12 }
  0x48   :  { %521 = vmatprep.subr.bf16.mxu0 %v722_v0  ;;  %541 = vmatprep.subr.bf16.mxu1 %v722_v0 }
  0x4b   :  { %522 = vmatpush3.bf16.msra.mxu0 %v587_v9  ;;  %542 = vmatpush3.bf16.msra.mxu1 %v595_v17 }
  0x4c   :  { %523 = vmatprep.subr.bf16.mxu0 %v722_v0  ;;  %543 = vmatprep.subr.bf16.mxu1 %v722_v0 }
  0x4f   :  { %524 = vmatpush3.bf16.msra.mxu0 %v588_v11  ;;  %544 = vmatpush3.bf16.msra.mxu1 %v596_v18 }
  0x50   :  { %525 = vmatprep.subr.bf16.mxu0 %v722_v0  ;;  %545 = vmatprep.subr.bf16.mxu1 %v722_v0 }
  0x53   :  { %526 = vmatpush3.bf16.msra.mxu0 %v589_v13  ;;  %546 = vmatpush3.bf16.msra.mxu1 %v597_v19 }
  0x54   :  { %551 = vmatprep.subr.bf16.mxu0 %v722_v0 }
  0x56   :  { %528 = vmatmul.mubr.bf16.vlgmr.msra.gmra.mxu0 %v102_v16 }
  0x57   :  { %567 = vmatprep.mubr.msk.bf16.mxu0 %vm723_vm0, %v722_v0  ;;  %552 = vmatpush3.bf16.msra.mxu0 %v598_v20 }
  0x58   :  { %553 = vmatprep.subr.bf16.mxu0 %v722_v0 }
  0x5b   :  { %554 = vmatpush3.bf16.msra.mxu0 %v599_v21 }
  0x5c   :  { %555 = vmatprep.subr.bf16.mxu0 %v722_v0 }
  0x5f   :  { %556 = vmatpush3.bf16.msra.mxu0 %v600_v22 }
  0x60   :  { %557 = vmatprep.subr.bf16.mxu0 %v722_v0 }
  0x63   :  { %558 = vmatpush3.bf16.msra.mxu0 %v601_v23 }
  0x64   :  { %559 = vmatprep.subr.bf16.mxu0 %v722_v0 }
  0x67   :  { %560 = vmatpush3.bf16.msra.mxu0 %v602_v24 }
  0x68   :  { %561 = vmatprep.subr.bf16.mxu0 %v722_v0 }
  0x6b   :  { %562 = vmatpush3.bf16.msra.mxu0 %v603_v37 }
  0x6c   :  { %563 = vmatprep.subr.bf16.mxu0 %v722_v0 }
  0x6f   :  { %564 = vmatpush3.bf16.msra.mxu0 %v604_v38 }
  0x70   :  { %565 = vmatprep.subr.bf16.mxu0 %v722_v0 }
  0x73   :  { %566 = vmatpush3.bf16.msra.mxu0 %v605_v39 }
 0x116   :  { %v191_v26 = vpop.f32.mrf.mxu0 }
 0x117   :  { %v192_v27 = vadd.f32 %v457_v25, %v191_v26 }
 0x118   :  { %v529_v28 = vpop.f32.mrf.mxu0 }
 0x119   :  { %v200_v30 = vmul.f32 0.01, %v192_v27  ;;  %vm198_vm1 = vcmp.gt.f32.partialorder %v192_v27, 0.0 }
 0x11a   :  { %v194_v29 = vpop.f32.mrf.mxu0 }
 0x11b   :  { %v195_v31 = vadd.f32 %v457_v25, %v194_v29  ;;  %v202_v34 = vsel %vm198_vm1, %v192_v27, %v200_v30 }
 0x11c   :  { %v530_v32 = vpop.f32.mrf.mxu0 }
 0x11d   :  { %vm199_vm2 = vcmp.gt.f32.partialorder %v195_v31, 0.0  ;;  %v201_v33 = vmul.f32 0.01, %v195_v31 }
 0x11f   :  { %v203_v35 = vsel %vm199_vm2, %v195_v31, %v201_v33 }
 0x120   :  { %v221_v36 = vpack.c.bf16 %v203_v35, %v202_v34 }
 0x122   :  { %548 = vmatmul.mubr.bf16.vlgmr.msra.gmra.mxu1 %v221_v36 }
 0x1e2   :  { %v310_v41 = vpop.f32.mrf.mxu1 }
 0x1e3   :  { %v311_v42 = vadd.f32 %v466_v40, %v310_v41 }
 0x1e4   :  { %v549_v43 = vpop.f32.mrf.mxu1 }
 0x1e5   :  { %v319_v45 = vmul.f32 0.01, %v311_v42  ;;  %vm317_vm3 = vcmp.gt.f32.partialorder %v311_v42, 0.0 }
 0x1e6   :  { %v313_v44 = vpop.f32.mrf.mxu1 }
 0x1e7   :  { %v314_v46 = vadd.f32 %v466_v40, %v313_v44  ;;  %v321_v49 = vsel %vm317_vm3, %v311_v42, %v319_v45 }
 0x1e8   :  { %v550_v47 = vpop.f32.mrf.mxu1 }
 0x1e9   :  { %vm318_vm4 = vcmp.gt.f32.partialorder %v314_v46, 0.0  ;;  %v320_v48 = vmul.f32 0.01, %v314_v46 }
 0x1eb   :  { %v322_v50 = vsel %vm318_vm4, %v314_v46, %v320_v48 }
 0x1ec   :  { %v340_v51 = vpack.c.bf16 %v322_v50, %v321_v49 }
 0x1ee   :  { %568 = vmatmul.mubr.bf16.vlgmr.msra.gmra.mxu0 %v340_v51 }
 0x2ae   :  { %v429_v53 = vpop.f32.mrf.mxu0 }
 0x2af   :  { %v430_v54 = vadd.f32 %v475_v52, %v429_v53 }
 0x2b0   :  { %v569_v55 = vpop.f32.mrf.mxu0 }
 0x2b1   :  { %436 = vst [vmem:[#allocation10] sm:$0xff] %v430_v54 }
 0x2b2   :  { %v432_v56 = vpop.f32.mrf.mxu0 }
 0x2b3   :  { %v433_v57 = vadd.f32 %v475_v52, %v432_v56 }
 0x2b4   :  { %v570_v58 = vpop.f32.mrf.mxu0 }
 0x2b5   :  { %437 = vst [vmem:[#allocation10 + $0x8] sm:$0xff] %v433_v57 }
 0x2b6   :  { %697 = shalt.err (!%p694_p10)
}
 0x2b7   :  { %449 = dma.vmem_to_hbm [thread:$0]  %s444_s26, 256, %s841_s7, [#allocation4], %s718_s11, %s718_s11, %s719_s12  }
 0x2b8   :  { %712 = dma.done.wait [#allocation4], 256  }
 0x2b9   :  { %713 = vsyncadd [#allocation4], 4294967040 }
 0x2ba   :  { %453 = vsyncpa [#allocation3], 1 }
 0x2bb   :  { %454 = vsyncpa [#allocation6], 1 }
 0x2bc   :  { %455 = vsyncpa [#allocation9], 1 }
 0x2bd   :  { %456 = vsyncpa [#allocation4], 1 }

</bundles_post_ra>
